<compile_context>
chip_gen: v7x
topology: tpu7x:2x2x1
jax: 0.10.0
libtpu: 0.0.40
codegen_flags: <defaults>
</compile_context>

<pallas_src>
import functools

import jax
import jax.numpy as jnp
import numpy as np
from jax.experimental import pallas as pl
from jax.experimental.pallas import tpu as pltpu


def my_attention_kernel(x_ref, rm_ref, wx_ref, bx_ref, ww_ref, bw_ref,
                        out_ref, a_ref, a2_ref, *, c_in):
    """One grid step: B_BLK batch rows, full (padded) time axis.

    x_ref : (B_BLK, C_in, T_pad)      matmul dtype (f32 or bf16)
    rm_ref: (B_BLK, 1,    T_pad) f32  {0,1}; padded time lanes are 1 (masked)
    wx_ref: (2*C_in + C_out, C_in)    stacked [w_tanh; w_sigm; w_final]
    bx_ref: (2*C_in + C_out, 1)  f32  stacked biases
    ww_ref: (C_out, C_in), bw_ref: (C_out, 1)
    out_ref: (B_BLK, C_out); a_ref / a2_ref: (B_BLK, C_out, T_pad)
    """
    x = x_ref[...]
    rm = rm_ref[...]
    b_blk = x.shape[0]

    # Single stacked matmul for the three x-consuming 1x1 convs (f32 accumulation).
    wx = jnp.broadcast_to(wx_ref[...], (b_blk,) + wx_ref.shape)
    y = jnp.einsum("bkc,bct->bkt", wx, x, preferred_element_type=jnp.float32)
    y = y + bx_ref[...][None, :, :]                        # (B_BLK, K, T_pad) f32

    pre_tanh = y[:, :c_in, :]
    pre_sigm = y[:, c_in:2 * c_in, :]
    final = y[:, 2 * c_in:, :]                             # conv_final(x) + bias

    gated = jnp.tanh(pre_tanh) * jax.nn.sigmoid(pre_sigm)  # f32 elementwise
    gated = gated.astype(ww_ref.dtype)                     # bf16 on v6e/v7x path

    ww = jnp.broadcast_to(ww_ref[...], (b_blk,) + ww_ref.shape)
    z = jnp.einsum("bkc,bct->bkt", ww, gated, preferred_element_type=jnp.float32)
    z = z + bw_ref[...][None, :, :]                        # (B_BLK, C_out, T_pad)

    # Mask: remove_matrix == 1 -> -inf (broadcast over channels).  Padded time
    # lanes carry rm == 1, so they vanish from the softmax and the final sum.
    # NOTE: a real row that is fully masked yields 0/0 -> NaN, matching PyTorch.
    z = jnp.where(rm == 1.0, -jnp.inf, z)

    # Softmax over time (lane axis).
    m = jnp.max(z, axis=-1, keepdims=True)
    e = jnp.exp(z - m)
    denom = jnp.sum(e, axis=-1, keepdims=True)
    # approx=False keeps the 1e-5 check intact; approx=True (EUP vrcp, ~1e-4 rel
    # err) is a near-free swap when that accuracy is acceptable.
    a = e * pl.reciprocal(denom, approx=False)

    a2 = final * a
    a_ref[...] = a.astype(a_ref.dtype)
    a2_ref[...] = a2.astype(a2_ref.dtype)
    # Lane-dense summed output: (B_BLK, C_out), no trailing size-1 dim.
    out_ref[...] = jnp.sum(a2, axis=-1).astype(out_ref.dtype)


def my_attention(inputs, remove_matrix, params, *, b_blk=8,
                 compute_dtype=jnp.float32):
    """inputs: (B, C_in, T) f32; remove_matrix: (B, 1, T) f32 of {0,1}.

    Returns (output (B, C_out), a (B, C_out, T), a2 (B, C_out, T)), matching the
    PyTorch module.  compute_dtype=jnp.bfloat16 puts the MXU matmul operands in
    bf16 (recommended on v6e/v7x); accumulation / elementwise math stays f32.
    """
    B, C_in, T = inputs.shape
    C_out = params["w_w"].shape[0]

    # Pad time to a lane-dense multiple of 128; pad lanes are masked (rm = 1).
    T_pad = ((T + 127) // 128) * 128
    b_blk = max(1, min(b_blk, B))
    B_pad = ((B + b_blk - 1) // b_blk) * b_blk

    x = jnp.pad(inputs, ((0, 0), (0, 0), (0, T_pad - T)))
    x = jnp.pad(x, ((0, B_pad - B), (0, 0), (0, 0)))
    rm = jnp.pad(remove_matrix, ((0, 0), (0, 0), (0, T_pad - T)),
                 constant_values=1.0)
    # Padded batch rows keep rm = 0 everywhere so their (discarded) softmax stays
    # well-defined (no all-masked NaN rows).
    rm = jnp.pad(rm, ((0, B_pad - B), (0, 0), (0, 0)), constant_values=0.0)

    # Stack the three weights that consume x into one matmul; conv_w stays apart
    # (it consumes the gated activations).
    wx = jnp.concatenate(
        [params["w_tanh"], params["w_sigm"], params["w_final"]], axis=0)
    bx = jnp.concatenate(
        [params["b_tanh"], params["b_sigm"], params["b_final"]], axis=0)
    ww, bw = params["w_w"], params["b_w"]
    K = 2 * C_in + C_out

    x = x.astype(compute_dtype)
    wx = wx.astype(compute_dtype)
    ww = ww.astype(compute_dtype)
    rm = rm.astype(jnp.float32)
    bx = bx.astype(jnp.float32)
    bw = bw.astype(jnp.float32)

    def weight_spec(shape):
        # Grid-invariant operands.  For production channel counts, add
        # pipeline_mode=pl.Buffered(1) to skip double-buffering; at these sizes
        # the VMEM saving is negligible.
        return pl.BlockSpec(shape, lambda i, _n=len(shape): (0,) * _n)

    grid_spec = pltpu.PrefetchScalarGridSpec(
        num_scalar_prefetch=0,
        grid=(B_pad // b_blk,),
        in_specs=[
            pl.BlockSpec((b_blk, C_in, T_pad), lambda i: (i, 0, 0)),   # x
            pl.BlockSpec((b_blk, 1, T_pad), lambda i: (i, 0, 0)),      # remove
            weight_spec((K, C_in)), weight_spec((K, 1)),               # stacked
            weight_spec((C_out, C_in)), weight_spec((C_out, 1)),       # conv_w
        ],
        out_specs=[
            pl.BlockSpec((b_blk, C_out), lambda i: (i, 0)),            # summed
            pl.BlockSpec((b_blk, C_out, T_pad), lambda i: (i, 0, 0)),  # a
            pl.BlockSpec((b_blk, C_out, T_pad), lambda i: (i, 0, 0)),  # a2
        ],
    )
    out_shapes = (
        jax.ShapeDtypeStruct((B_pad, C_out), jnp.float32),
        jax.ShapeDtypeStruct((B_pad, C_out, T_pad), jnp.float32),
        jax.ShapeDtypeStruct((B_pad, C_out, T_pad), jnp.float32),
    )
    out, a, a2 = pl.pallas_call(
        functools.partial(my_attention_kernel, c_in=C_in),
        out_shape=out_shapes,
        grid_spec=grid_spec,
        # Batch blocks are independent -> "parallel" lets v7x shard the grid
        # across both TensorCores; neutral on v5e/v6e.
        # TODO(synk): for large T / B_BLK on v7x (64 MiB VMEM, 32 MiB scoped
        # default) re-budget and set vmem_limit_bytes or tile T (online softmax).
        compiler_params=pltpu.CompilerParams(
            dimension_semantics=("parallel",)),
    )(x, rm, wx, bx, ww, bw)

    return out[:B], a[:B, :, :T], a2[:B, :, :T]


def init_params(key, in_size, out_size):
    """Deterministic Conv1d(k=1) param init (uniform, PyTorch-style bound)."""
    ks = jax.random.split(key, 8)
    bound = 1.0 / np.sqrt(in_size)

    def u(k, shape):
        return jax.random.uniform(k, shape, jnp.float32, -bound, bound)

    return {
        "w_tanh": u(ks[0], (in_size, in_size)),   "b_tanh": u(ks[1], (in_size, 1)),
        "w_sigm": u(ks[2], (in_size, in_size)),   "b_sigm": u(ks[3], (in_size, 1)),
        "w_w":    u(ks[4], (out_size, in_size)),  "b_w":    u(ks[5], (out_size, 1)),
        "w_final": u(ks[6], (out_size, in_size)), "b_final": u(ks[7], (out_size, 1)),
    }


def reference(inputs, remove_matrix, params):
    """Pure-JAX mirror of the PyTorch forward, for correctness checking."""
    def conv1x1(x, w, b):
        return jnp.einsum("oc,bct->bot", w, x) + b[None, :, :]

    tanh = jnp.tanh(conv1x1(inputs, params["w_tanh"], params["b_tanh"]))
    sigm = jax.nn.sigmoid(conv1x1(inputs, params["w_sigm"], params["b_sigm"]))
    z = conv1x1(tanh * sigm, params["w_w"], params["b_w"])
    z = jnp.where(remove_matrix == 1.0, -jnp.inf, z)
    a = jax.nn.softmax(z, axis=2)
    output = conv1x1(inputs, params["w_final"], params["b_final"])
    a2 = output * a
    return jnp.sum(a2, axis=2), a, a2


if __name__ == "__main__":
    B, IN, OUT, T = 2, 8, 4, 16
    LEVELS = 2  # unused in forward (kept for parity with the module signature)

    key = jax.random.PRNGKey(0)
    k_x, k_p = jax.random.split(key)

    x = jax.random.normal(k_x, (B, IN, T), dtype=jnp.float32)
    # remove_matrix: (B, 1, T), mask out the last few time steps (never all)
    rm = (jnp.arange(T)[None, None, :] >= 12).astype(jnp.float32)
    rm = jnp.broadcast_to(rm, (B, 1, T))

    params = init_params(k_p, IN, OUT)
    ref_out, ref_a, ref_a2 = reference(x, rm, params)

    # f32 MXU-operand path: exact-tolerance check.
    out, a, a2 = my_attention(x, rm, params)
    jax.block_until_ready((out, a, a2))
    np.testing.assert_allclose(np.asarray(out), np.asarray(ref_out), rtol=1e-5, atol=1e-5)
    np.testing.assert_allclose(np.asarray(a), np.asarray(ref_a), rtol=1e-5, atol=1e-5)
    np.testing.assert_allclose(np.asarray(a2), np.asarray(ref_a2), rtol=1e-5, atol=1e-5)

    # bf16 MXU-operand path (recommended on v6e/v7x): looser tolerance.
    out16, a16, a216 = my_attention(x, rm, params, compute_dtype=jnp.bfloat16)
    jax.block_until_ready((out16, a16, a216))
    np.testing.assert_allclose(np.asarray(out16), np.asarray(ref_out), rtol=5e-2, atol=5e-2)
    np.testing.assert_allclose(np.asarray(a16), np.asarray(ref_a), rtol=5e-2, atol=5e-2)
    np.testing.assert_allclose(np.asarray(a216), np.asarray(ref_a2), rtol=5e-2, atol=5e-2)

    print("KERNEL_OK")
</pallas_src>

<mosaic_0001>
module attributes {stable_mosaic.version = 11 : i64} {
  func.func @my_attention_kernel(%arg0: i32, %arg1: memref<2x8x128xf32, #tpu.memory_space<vmem>>, %arg2: memref<2x1x128xf32, #tpu.memory_space<vmem>>, %arg3: memref<20x8xf32, #tpu.memory_space<vmem>>, %arg4: memref<20x1xf32, #tpu.memory_space<vmem>>, %arg5: memref<4x8xf32, #tpu.memory_space<vmem>>, %arg6: memref<4x1xf32, #tpu.memory_space<vmem>>, %arg7: memref<2x4xf32, #tpu.memory_space<vmem>>, %arg8: memref<2x4x128xf32, #tpu.memory_space<vmem>>, %arg9: memref<2x4x128xf32, #tpu.memory_space<vmem>>) attributes {dimension_semantics = [#tpu.dimension_semantics<parallel>], iteration_bounds = array<i64: 1>, scalar_prefetch = 0 : i64, scratch_operands = 0 : i64, tpu.core_type = #tpu.core_type<tc>, window_params = [{transform_indices = @transform_0, window_bounds = array<i64: 2, 8, 128>}, {transform_indices = @transform_1, window_bounds = array<i64: 2, 1, 128>}, {pipeline_mode = #tpu.pipeline_mode<synchronous>, transform_indices = @transform_2, window_bounds = array<i64: 20, 8>}, {pipeline_mode = #tpu.pipeline_mode<synchronous>, transform_indices = @transform_3, window_bounds = array<i64: 20, 1>}, {pipeline_mode = #tpu.pipeline_mode<synchronous>, transform_indices = @transform_4, window_bounds = array<i64: 4, 8>}, {pipeline_mode = #tpu.pipeline_mode<synchronous>, transform_indices = @transform_5, window_bounds = array<i64: 4, 1>}, {transform_indices = @transform_6, window_bounds = array<i64: 2, 4>}, {transform_indices = @transform_7, window_bounds = array<i64: 2, 4, 128>}, {transform_indices = @transform_8, window_bounds = array<i64: 2, 4, 128>}]} {
    %c0 = arith.constant 0 : index
    %c0_0 = arith.constant 0 : index
    %c0_1 = arith.constant 0 : index
    %0 = vector.load %arg1[%c0, %c0_0, %c0_1] : memref<2x8x128xf32, #tpu.memory_space<vmem>>, vector<2x8x128xf32>
    %c0_2 = arith.constant 0 : index
    %c0_3 = arith.constant 0 : index
    %c0_4 = arith.constant 0 : index
    %1 = vector.load %arg2[%c0_2, %c0_3, %c0_4] : memref<2x1x128xf32, #tpu.memory_space<vmem>>, vector<2x1x128xf32>
    %c0_5 = arith.constant 0 : index
    %c0_6 = arith.constant 0 : index
    %2 = vector.load %arg3[%c0_5, %c0_6] : memref<20x8xf32, #tpu.memory_space<vmem>>, vector<20x8xf32>
    %3 = vector.shape_cast %2 : vector<20x8xf32> to vector<1x20x8xf32>
    %4 = vector.broadcast %3 : vector<1x20x8xf32> to vector<2x20x8xf32>
    "tpu.trace_start"() <{level = 10 : i32, message = "bkc,bct->bkt"}> : () -> ()
    %cst = arith.constant dense<0.000000e+00> : vector<2x20x128xf32>
    %5 = tpu.matmul %4, %0, %cst {dimension_numbers = #tpu.dot_dimension_numbers<[2], [1], [1], [2], [0, 0, 0, 1, 1, 2], [0], [0]>} : vector<2x20x8xf32>, vector<2x8x128xf32>, vector<2x20x128xf32> -> vector<2x20x128xf32>
    "tpu.trace_stop"() : () -> ()
    %c0_7 = arith.constant 0 : index
    %c0_8 = arith.constant 0 : index
    %6 = vector.load %arg4[%c0_7, %c0_8] : memref<20x1xf32, #tpu.memory_space<vmem>>, vector<20x1xf32>
    %7 = vector.shape_cast %6 : vector<20x1xf32> to vector<1x20x1xf32>
    %8 = vector.broadcast %7 : vector<1x20x1xf32> to vector<2x20x128xf32>
    %9 = arith.addf %5, %8 : vector<2x20x128xf32>
    %10 = vector.extract_strided_slice %9 {offsets = [0, 0, 0], sizes = [2, 8, 128], strides = [1, 1, 1]} : vector<2x20x128xf32> to vector<2x8x128xf32>
    %11 = vector.extract_strided_slice %9 {offsets = [0, 8, 0], sizes = [2, 8, 128], strides = [1, 1, 1]} : vector<2x20x128xf32> to vector<2x8x128xf32>
    %12 = vector.extract_strided_slice %9 {offsets = [0, 16, 0], sizes = [2, 4, 128], strides = [1, 1, 1]} : vector<2x20x128xf32> to vector<2x4x128xf32>
    %13 = math.tanh %10 : vector<2x8x128xf32>
    %14 = arith.negf %11 : vector<2x8x128xf32>
    %15 = math.exp %14 : vector<2x8x128xf32>
    %cst_9 = arith.constant 1.000000e+00 : f32
    %16 = vector.broadcast %cst_9 : f32 to vector<2x8x128xf32>
    %17 = arith.addf %16, %15 : vector<2x8x128xf32>
    %18 = arith.divf %16, %17 : vector<2x8x128xf32>
    %19 = arith.mulf %13, %18 : vector<2x8x128xf32>
    %c0_10 = arith.constant 0 : index
    %c0_11 = arith.constant 0 : index
    %20 = vector.load %arg5[%c0_10, %c0_11] : memref<4x8xf32, #tpu.memory_space<vmem>>, vector<4x8xf32>
    %21 = vector.shape_cast %20 : vector<4x8xf32> to vector<1x4x8xf32>
    %22 = vector.broadcast %21 : vector<1x4x8xf32> to vector<2x4x8xf32>
    "tpu.trace_start"() <{level = 10 : i32, message = "bkc,bct->bkt"}> : () -> ()
    %cst_12 = arith.constant dense<0.000000e+00> : vector<2x4x128xf32>
    %23 = tpu.matmul %22, %19, %cst_12 {dimension_numbers = #tpu.dot_dimension_numbers<[2], [1], [1], [2], [0, 0, 0, 1, 1, 2], [0], [0]>} : vector<2x4x8xf32>, vector<2x8x128xf32>, vector<2x4x128xf32> -> vector<2x4x128xf32>
    "tpu.trace_stop"() : () -> ()
    %c0_13 = arith.constant 0 : index
    %c0_14 = arith.constant 0 : index
    %24 = vector.load %arg6[%c0_13, %c0_14] : memref<4x1xf32, #tpu.memory_space<vmem>>, vector<4x1xf32>
    %25 = vector.shape_cast %24 : vector<4x1xf32> to vector<1x4x1xf32>
    %26 = vector.broadcast %25 : vector<1x4x1xf32> to vector<2x4x128xf32>
    %27 = arith.addf %23, %26 : vector<2x4x128xf32>
    %cst_15 = arith.constant 1.000000e+00 : f32
    %28 = vector.broadcast %cst_15 : f32 to vector<2x1x128xf32>
    %29 = arith.cmpf oeq, %1, %28 : vector<2x1x128xf32>
    %cst_16 = arith.constant 0xFF800000 : f32
    %30 = vector.shape_cast %29 : vector<2x1x128xi1> to vector<2x1x128xi1>
    %31 = vector.broadcast %30 : vector<2x1x128xi1> to vector<2x4x128xi1>
    %32 = vector.broadcast %cst_16 : f32 to vector<2x4x128xf32>
    %33 = arith.select %31, %32, %27 : vector<2x4x128xi1>, vector<2x4x128xf32>
    %cst_17 = arith.constant dense<0xFF800000> : vector<2x4xf32>
    %34 = vector.multi_reduction <maximumf>, %33, %cst_17 [2] : vector<2x4x128xf32> to vector<2x4xf32>
    %35 = vector.shape_cast %34 : vector<2x4xf32> to vector<2x4x1xf32>
    %36 = vector.broadcast %35 : vector<2x4x1xf32> to vector<2x4x128xf32>
    %37 = arith.subf %33, %36 : vector<2x4x128xf32>
    %38 = math.exp %37 : vector<2x4x128xf32>
    %cst_18 = arith.constant dense<0.000000e+00> : vector<2x4xf32>
    %39 = vector.multi_reduction <add>, %38, %cst_18 [2] : vector<2x4x128xf32> to vector<2x4xf32>
    %40 = vector.shape_cast %39 : vector<2x4xf32> to vector<2x4x1xf32>
    %41 = tpu.reciprocal %40 : vector<2x4x1xf32> -> vector<2x4x1xf32>
    %42 = vector.broadcast %41 : vector<2x4x1xf32> to vector<2x4x128xf32>
    %43 = arith.mulf %38, %42 : vector<2x4x128xf32>
    %44 = arith.mulf %12, %43 : vector<2x4x128xf32>
    %c0_19 = arith.constant 0 : index
    %c0_20 = arith.constant 0 : index
    %c0_21 = arith.constant 0 : index
    %45 = vector.load %arg8[%c0_19, %c0_20, %c0_21] : memref<2x4x128xf32, #tpu.memory_space<vmem>>, vector<2x4x128xf32>
    tpu.vector_store %arg8[%c0_19, %c0_20, %c0_21], %43 {strides = array<i32>} : memref<2x4x128xf32, #tpu.memory_space<vmem>>, vector<2x4x128xf32>,
    %c0_22 = arith.constant 0 : index
    %c0_23 = arith.constant 0 : index
    %c0_24 = arith.constant 0 : index
    %46 = vector.load %arg9[%c0_22, %c0_23, %c0_24] : memref<2x4x128xf32, #tpu.memory_space<vmem>>, vector<2x4x128xf32>
    tpu.vector_store %arg9[%c0_22, %c0_23, %c0_24], %44 {strides = array<i32>} : memref<2x4x128xf32, #tpu.memory_space<vmem>>, vector<2x4x128xf32>,
    %cst_25 = arith.constant dense<0.000000e+00> : vector<2x4xf32>
    %47 = vector.multi_reduction <add>, %44, %cst_25 [2] : vector<2x4x128xf32> to vector<2x4xf32>
    %c0_26 = arith.constant 0 : index
    %c0_27 = arith.constant 0 : index
    %48 = vector.load %arg7[%c0_26, %c0_27] : memref<2x4xf32, #tpu.memory_space<vmem>>, vector<2x4xf32>
    tpu.vector_store %arg7[%c0_26, %c0_27], %47 {strides = array<i32>} : memref<2x4xf32, #tpu.memory_space<vmem>>, vector<2x4xf32>,
    return
  }
  func.func @transform_0(%arg0: i32) -> (i32, i32, i32) {
    %c0_i32 = arith.constant 0 : i32
    %c0_i32_0 = arith.constant 0 : i32
    %c0_i32_1 = arith.constant 0 : i32
    return %arg0, %c0_i32, %c0_i32_0 : i32, i32, i32
  }
  func.func @transform_1(%arg0: i32) -> (i32, i32, i32) {
    %c0_i32 = arith.constant 0 : i32
    %c0_i32_0 = arith.constant 0 : i32
    %c0_i32_1 = arith.constant 0 : i32
    return %arg0, %c0_i32, %c0_i32_0 : i32, i32, i32
  }
  func.func @transform_2(%arg0: i32) -> (i32, i32) {
    %c0_i32 = arith.constant 0 : i32
    %c0_i32_0 = arith.constant 0 : i32
    %c0_i32_1 = arith.constant 0 : i32
    return %c0_i32, %c0_i32_0 : i32, i32
  }
  func.func @transform_3(%arg0: i32) -> (i32, i32) {
    %c0_i32 = arith.constant 0 : i32
    %c0_i32_0 = arith.constant 0 : i32
    %c0_i32_1 = arith.constant 0 : i32
    return %c0_i32, %c0_i32_0 : i32, i32
  }
  func.func @transform_4(%arg0: i32) -> (i32, i32) {
    %c0_i32 = arith.constant 0 : i32
    %c0_i32_0 = arith.constant 0 : i32
    %c0_i32_1 = arith.constant 0 : i32
    return %c0_i32, %c0_i32_0 : i32, i32
  }
  func.func @transform_5(%arg0: i32) -> (i32, i32) {
    %c0_i32 = arith.constant 0 : i32
    %c0_i32_0 = arith.constant 0 : i32
    %c0_i32_1 = arith.constant 0 : i32
    return %c0_i32, %c0_i32_0 : i32, i32
  }
  func.func @transform_6(%arg0: i32) -> (i32, i32) {
    %c0_i32 = arith.constant 0 : i32
    %c0_i32_0 = arith.constant 0 : i32
    return %arg0, %c0_i32 : i32, i32
  }
  func.func @transform_7(%arg0: i32) -> (i32, i32, i32) {
    %c0_i32 = arith.constant 0 : i32
    %c0_i32_0 = arith.constant 0 : i32
    %c0_i32_1 = arith.constant 0 : i32
    return %arg0, %c0_i32, %c0_i32_0 : i32, i32, i32
  }
  func.func @transform_8(%arg0: i32) -> (i32, i32, i32) {
    %c0_i32 = arith.constant 0 : i32
    %c0_i32_0 = arith.constant 0 : i32
    %c0_i32_1 = arith.constant 0 : i32
    return %arg0, %c0_i32, %c0_i32_0 : i32, i32, i32
  }
}

</mosaic_0001>

<bundles_post_ra>
// kernel: tpu_custom_call.1
= control target key start
LH: loop header
LB: loop body
LE: loop exit
PB: predicated region body
PF: predicated region fallthrough
CT: control target
= control target key end

     0   :  { %14 = vsyncpa [#allocation3], 0  ;;  %v656_v2 = vmov 0.0   ;;  %vm53_vm0 = vcmask 64512   ;;  %vm657_vm1 = vmmov 0   ;;  %s813_s0 = inlined_call_operand.vmem [shape: f32[2,8,128], index: 0, kind: input, shape index: {}]   ;;  %s814_s1 = inlined_call_operand.vmem [shape: f32[2,1,128], index: 1, kind: input, shape index: {}]   ;;  %s815_s2 = inlined_call_operand.vmem [shape: f32[20,8], index: 2, kind: input, shape index: {}]   ;;  %s816_s3 = inlined_call_operand.vmem [shape: f32[20,1], index: 3, kind: input, shape index: {}]   ;;  %s817_s4 = inlined_call_operand.vmem [shape: f32[4,8], index: 4, kind: input, shape index: {}]   ;;  %s818_s5 = inlined_call_operand.vmem [shape: f32[4,1], index: 5, kind: input, shape index: {}]   ;;  %s819_s6 = inlined_call_operand.hbm [shape: f32[2,4], index: 6, kind: output, shape index: {0}]   ;;  %s820_s7 = inlined_call_operand.hbm [shape: f32[2,4,128], index: 7, kind: output, shape index: {1}]   ;;  %s821_s8 = inlined_call_operand.hbm [shape: f32[2,4,128], index: 8, kind: output, shape index: {2}]  }
   0x1   :  { %v28_v0 = vld [vmem:[%s813_s0] sm:$0xff]  ;;  %v29_v1 = vld [vmem:[%s813_s0 + $0x8] sm:$0xff]  ;;  %524 = vmatprep.subr.mxu0 %v656_v2  ;;  %535 = vmatprep.subr.mxu1 %v656_v2 }
   0x2   :  { %v32_v3 = vld [vmem:[%s815_s2] sm:$0xff]  ;;  %525 = vmatpush3.msra.mxu0 %v28_v0  ;;  %526 = vmatprep.mubr.msk.f32.mxu0 %vm657_vm1, %v656_v2 }
   0x3   :  { %15 = vsyncpa [#allocation5], 0  ;;  %536 = vmatpush3.msra.mxu1 %v29_v1  ;;  %537 = vmatprep.mubr.msk.f32.mxu1 %vm657_vm1, %v656_v2  ;;  %v36_v4 = vld [vmem:[%s816_s3 + $0x8] sm:$0xff]  ;;  %v658_v6 = vmov 0   ;;  %v35_v7 = vld [vmem:[%s816_s3] sm:$0xff]  ;;  %v393_v41 = vlaneseq  ;;  %vm405_vm6 = vcmask 1043456  }
   0x4   :  { %527 = vmatmul.mubr.msk.f32.vlgmr.msra.gmra.mrb[0].mxu0 %vm53_vm0, %v32_v3  ;;  %538 = vmatmul.mubr.msk.f32.vlgmr.msra.gmra.mrb[0].mxu1 %vm53_vm0, %v32_v3  ;;  %v33_v5 = vld [vmem:[%s815_s2 + $0x8] sm:$0xff]  ;;  %v34_v8 = vld [vmem:[%s815_s2 + $0x10] sm:$0xf]  ;;  %v240_v9 = vld [vmem:[%s818_s5] sm:$0xf] }
   0x5   :  { %529 = vmatprep.mubr.msk.f32.mxu0 %vm657_vm1, %v656_v2  ;;  %540 = vmatprep.mubr.msk.f32.mxu1 %vm657_vm1, %v656_v2  ;;  %v239_v35 = vld [vmem:[%s817_s4] sm:$0xf]  ;;  %v761_v44 = vshrl.u32 %v393_v41, 7 }
   0x6   :  { %564 = vset.pattern.permute.xlu0 %v658_v6  ;;  %546 = vmatprep.subr.mxu0 %v656_v2  ;;  %v30_v42 = vld [vmem:[%s814_s1] sm:$0x1]  ;;  %v31_v43 = vld [vmem:[%s814_s1 + $0x1] sm:$0x1] }
   0x7   :  { %45 = vperm.xlu0 %564, %v36_v4   ;;  %551 = vmatprep.subr.mxu1 %v656_v2  ;;  %vm389_vm2 = vcmp.eq.f32.partialorder %v30_v42, 1.0  ;;  %vm390_vm3 = vcmp.eq.f32.partialorder %v31_v43, 1.0  ;;  %v395_v45 = vsub.s32 0, %v761_v44 }
   0x8   :  { %530 = vmatmul.mubr.msk.f32.gmra.mrb[2].mxu0 %vm53_vm0, %v33_v5  ;;  %541 = vmatmul.mubr.msk.f32.gmra.mrb[2].mxu1 %vm53_vm0, %v33_v5  ;;  %v391_v46 = vsel %vm389_vm2, 1, %v658_v6  ;;  %v392_v47 = vsel %vm390_vm3, 1, %v658_v6 }
   0x9   :  { %532 = vmatprep.mubr.msk.f32.mxu0 %vm657_vm1, %v656_v2  ;;  %543 = vmatprep.mubr.msk.f32.mxu1 %vm657_vm1, %v656_v2  ;;  %v396_v48 = vrot.slane %v391_v46, %v395_v45  ;;  %v400_v49 = vrot.slane %v392_v47, %v395_v45 }
   0xa   :  { %565 = vset.pattern.permute.xlu1 %v658_v6 }
   0xb   :  { %40 = vperm.xlu0 %564, %v35_v7   ;;  %243 = vperm.xlu1 %565, %v240_v9   ;;  %vm401_vm4 = vcmp.eq.s32.totalorder %v396_v48, 1  ;;  %vm402_vm5 = vcmp.eq.s32.totalorder %v400_v49, 1  ;;  %v37_v7 = vld [vmem:[%s816_s3 + $0x10] sm:$0xf]  ;;  %s659_s3 = smov [#allocation4]  }
   0xc   :  { %533 = vmatmul.mubr.msk.f32.gmra.mrb[4].mxu0 %vm53_vm0, %v34_v8  ;;  %544 = vmatmul.mubr.msk.f32.gmra.mrb[4].mxu1 %vm53_vm0, %v34_v8  ;;  %s472_s24 = sshll.u32 %s659_s3, 4  ;;  %s473_s24 = int_to_ptr.vmem [resolvable:$true] %s472_s24 }
   0xd   :  { %548 = vmatprep.mubr.msk.f32.mxu0 %vm657_vm1, %v656_v2  ;;  %553 = vmatprep.mubr.msk.f32.mxu1 %vm657_vm1, %v656_v2  ;;  %s586_s25 = scalar_lea.vmem %s473_s24, 128  ;;  %p591_p1 = scmp.lt.s32.totalorder %s473_s24, %s473_s24 }
   0xe   :  { %p587_p0 = scmp.ne.s32.totalorder %s473_s24, %s586_s25  ;;  %p592_p2 = scmp.lt.s32.totalorder %s586_s25, %s586_s25 }
  0x10   :  { %p593_p3 = por %p592_p2, %p591_p1 }
  0x12   :  { %p594_p4 = pnand %p593_p3, %p587_p0 }
  0x86   :  { %v46_v14 = vpop.permute.xlu0 %45 }
  0x8a   :  { %v41_v23 = vpop.permute.xlu0 %40  ;;  %v244_v50 = vpop.permute.xlu1 %243 }
  0xd7   :  { %v129_v10 = vpop.f32.mrb[0].mxu0  ;;  %v209_v11 = vpop.f32.mrb[0].mxu1 }
  0xd8   :  { %v528_v12 = vpop.f32.mrb[1].mxu0  ;;  %v539_v13 = vpop.f32.mrb[1].mxu1  ;;  %v130_v24 = vadd.f32 %v129_v10, %v41_v23  ;;  %v210_v25 = vadd.f32 %v209_v11, %v41_v23 }
  0xdb   :  { %v134_v15 = vpop.f32.mrb[2].mxu0  ;;  %v214_v16 = vpop.f32.mrb[2].mxu1 }
  0xdc   :  { %v135_v17 = vadd.f32 %v134_v15, %v46_v14  ;;  %v215_v18 = vadd.f32 %v214_v16, %v46_v14  ;;  %v531_v19 = vpop.f32.mrb[3].mxu0  ;;  %v542_v20 = vpop.f32.mrb[3].mxu1 }
  0xde   :  { %v508_v21 = vmul.f32 -1.442695, %v135_v17  ;;  %v509_v22 = vmul.f32 -1.442695, %v215_v18 }
  0xdf   :  { %v139_v37 = vpop.f32.mrb[4].mxu0  ;;  %v219_v38 = vpop.f32.mrb[4].mxu1 }
  0xe0   :  { %566 = vpow2.f32 %v508_v21  ;;  %v534_v39 = vpop.f32.mrb[5].mxu0  ;;  %v545_v40 = vpop.f32.mrb[5].mxu1 }
  0xe1   :  { %568 = vpow2.f32 %v509_v22 }
  0xe2   :  { %570 = vtanh.f32 %v130_v24 }
  0xe3   :  { %572 = vtanh.f32 %v210_v25 }
  0xea   :  { %v567_v26 = vpop.eup %566 }
  0xeb   :  { %v569_v27 = vpop.eup %568  ;;  %v231_v28 = vadd.f32 1.0, %v567_v26 }
  0xec   :  { %v232_v29 = vadd.f32 1.0, %v569_v27  ;;  %v571_v30 = vpop.eup %570 }
  0xed   :  { %574 = vrcp.f32 %v231_v28  ;;  %v573_v31 = vpop.eup %572 }
  0xee   :  { %576 = vrcp.f32 %v232_v29 }
  0xf7   :  { %v575_v32 = vpop.eup %574 }
  0xf8   :  { %v577_v33 = vpop.eup %576  ;;  %v237_v34 = vmul.f32 %v575_v32, %v571_v30 }
  0xf9   :  { %v238_v36 = vmul.f32 %v577_v33, %v573_v31 }
  0xfa   :  { %547 = vmatpush3.msra.mxu0 %v237_v34 }
  0xfb   :  { %552 = vmatpush3.msra.mxu1 %v238_v36  ;;  %549 = vmatmul.mubr.msk.f32.vlgmr.msra.gmra.mrb[6].mxu0 %vm53_vm0, %v239_v35 }
  0xfc   :  { %554 = vmatmul.mubr.msk.f32.vlgmr.msra.gmra.mrb[6].mxu1 %vm53_vm0, %v239_v35 }
 0x1ce   :  { %v315_v51 = vpop.f32.mrb[6].mxu0 }
 0x1cf   :  { %v316_v52 = vadd.f32 %v315_v51, %v244_v50  ;;  %v385_v53 = vpop.f32.mrb[6].mxu1  ;;  %v550_v54 = vpop.f32.mrb[7].mxu0 }
 0x1d0   :  { %v386_v55 = vadd.f32 %v385_v53, %v244_v50  ;;  %v555_v56 = vpop.f32.mrb[7].mxu1 }
 0x1d1   :  { %v403_v57 = vsel %vm401_vm4, -inf, %v316_v52 }
 0x1d2   :  { %v404_v58 = vsel %vm402_vm5, -inf, %v386_v55  ;;  %v406_v59 = vsel %vm405_vm6, %v403_v57, -inf }
 0x1d3   :  { %v409_v60 = vsel %vm405_vm6, %v404_v58, -inf  ;;  %407 = vmax.xlane.f32.xlu1 %v406_v59 }
 0x1d4   :  { %410 = vmax.xlane.f32.xlu0 %v409_v60 }
 0x260   :  { %v408_v61 = vpop.xlane.xlu1 %407 }
 0x261   :  { %v411_v62 = vpop.xlane.xlu0 %410  ;;  %v412_v63 = vsub.f32 %v403_v57, %v408_v61 }
 0x262   :  { %v413_v0 = vsub.f32 %v404_v58, %v411_v62 }
 0x263   :  { %v414_v1 = vmul.f32 1.442695, %v412_v63 }
 0x264   :  { %v416_v2 = vmul.f32 1.442695, %v413_v0 }
 0x265   :  { %578 = vpow2.f32 %v414_v1 }
 0x266   :  { %580 = vpow2.f32 %v416_v2 }
 0x26f   :  { %v579_v3 = vpop.eup %578 }
 0x270   :  { %v581_v4 = vpop.eup %580  ;;  %v418_v5 = vsel %vm405_vm6, %v579_v3, 0.0 }
 0x271   :  { %v421_v6 = vsel %vm405_vm6, %v581_v4, 0.0  ;;  %419 = vadd.xlane.f32.xlu0 %v418_v5 }
 0x272   :  { %422 = vadd.xlane.f32.xlu1 %v421_v6 }
 0x287   :  { %50 = vperm.xlu0 %564, %v37_v7  }
 0x2fe   :  { %v420_v8 = vpop.xlane.xlu0 %419 }
 0x2ff   :  { %582 = vrcp.f32 %v420_v8  ;;  %v423_v9 = vpop.xlane.xlu1 %422 }
 0x300   :  { %584 = vrcp.f32 %v423_v9 }
 0x306   :  { %v51_v10 = vpop.permute.xlu0 %50 }
 0x307   :  { %v140_v13 = vadd.f32 %v139_v37, %v51_v10  ;;  %v220_v15 = vadd.f32 %v219_v38, %v51_v10 }
 0x309   :  { %v583_v11 = vpop.eup %582 }
 0x30a   :  { %v585_v12 = vpop.eup %584  ;;  %v426_v14 = vmul.f32 %v583_v11, %v579_v3 }
 0x30b   :  { %v427_v16 = vmul.f32 %v585_v12, %v581_v4 }
 0x30c   :  { %v428_v17 = vmul.f32 %v426_v14, %v140_v13  ;;  %430 = vst [vmem:[#allocation4] sm:$0xf] %v426_v14 }
 0x30d   :  { %v429_v18 = vmul.f32 %v427_v16, %v220_v15  ;;  %431 = vst [vmem:[#allocation4 + $0x4] sm:$0xf] %v427_v16 }
 0x30e   :  { %v434_v19 = vsel %vm405_vm6, %v428_v17, 0.0  ;;  %432 = vst [vmem:[#allocation6] sm:$0xf] %v428_v17 }
 0x30f   :  { %435 = vadd.xlane.f32.xlu1 %v434_v19  ;;  %433 = vst [vmem:[#allocation6 + $0x4] sm:$0xf] %v429_v18  ;;  %v437_v20 = vsel %vm405_vm6, %v429_v18, 0.0 }
 0x313   :  { %438 = vadd.xlane.f32.xlu1 %v437_v20 }
 0x314   :  { %597 = shalt.err (!%p594_p4)
}
 0x315   :  { %s598_s28 = scalar_lea.hbm %s820_s7, 128 }
 0x316   :  { %p599_p5 = scmp.ne.s32.totalorder %s820_s7, %s598_s28  ;;  %p602_p6 = scmp.lt.u32.totalorder %s598_s28, %s820_s7 }
 0x318   :  { %p604_p7 = pnand %p602_p6, %p599_p5 }
 0x31a   :  { %607 = shalt.err (!%p604_p7)
}
 0x31b   :  { %s660_s0 = smov 64   ;;  %s661_s11 = smov 4  }
 0x31c   :  { %478 = dma.vmem_to_hbm [thread:$0]  %s473_s24, 128, %s820_s7, [#allocation5], %s660_s0, %s660_s0, %s661_s11  }
 0x31d   :  { %s662_s14 = smov [#allocation6]  }
 0x31e   :  { %s484_s15 = sshll.u32 %s662_s14, 4  ;;  %s485_s15 = int_to_ptr.vmem [resolvable:$true] %s484_s15 }
 0x31f   :  { %s608_s16 = scalar_lea.vmem %s485_s15, 128  ;;  %p613_p9 = scmp.lt.s32.totalorder %s485_s15, %s485_s15 }
 0x320   :  { %p609_p8 = scmp.ne.s32.totalorder %s485_s15, %s608_s16  ;;  %p614_p10 = scmp.lt.s32.totalorder %s608_s16, %s608_s16 }
 0x322   :  { %p615_p11 = por %p614_p10, %p613_p9 }
 0x324   :  { %p616_p12 = pnand %p615_p11, %p609_p8 }
 0x326   :  { %619 = shalt.err (!%p616_p12)
}
 0x327   :  { %s620_s19 = scalar_lea.hbm %s821_s8, 128 }
 0x328   :  { %p621_p13 = scmp.ne.s32.totalorder %s821_s8, %s620_s19  ;;  %p624_p0 = scmp.lt.u32.totalorder %s620_s19, %s821_s8 }
 0x32a   :  { %p626_p1 = pnand %p624_p0, %p621_p13 }
 0x32c   :  { %629 = shalt.err (!%p626_p1)
}
 0x32d   :  { %490 = dma.vmem_to_hbm [thread:$0]  %s485_s15, 128, %s821_s8, [#allocation5], %s660_s0, %s660_s0, %s661_s11   ;;  %v443_v21 = vand.u32 127, %v393_v41  ;;  %vm452_vm7 = vcmask 1041409   ;;  %vm455_vm8 = vcmask 25600  }
 0x32e   :  { %s663_s23 = smov [#allocation2]  }
 0x32f   :  { %v446_v23 = vsub.s32 %v443_v21, %v761_v44  ;;  %s463_s1 = sshll.u32 %s663_s23, 4  ;;  %s464_s1 = int_to_ptr.vmem [resolvable:$true] %s463_s1 }
 0x330   :  { %s630_s4 = scalar_lea.vmem %s464_s1, 32  ;;  %p635_p3 = scmp.lt.s32.totalorder %s464_s1, %s464_s1 }
 0x331   :  { %p631_p2 = scmp.ne.s32.totalorder %s464_s1, %s630_s4  ;;  %p636_p4 = scmp.lt.s32.totalorder %s630_s4, %s630_s4 }
 0x333   :  { %p637_p5 = por %p636_p4, %p635_p3 }
 0x335   :  { %p638_p6 = pnand %p637_p5, %p631_p2 }
 0x39c   :  { %v436_v22 = vpop.xlane.xlu1 %435 }
 0x39d   :  { %v447_v25 = vrot.slane %v436_v22, %v446_v23 }
 0x3a0   :  { %v439_v24 = vpop.xlane.xlu1 %438 }
 0x3a1   :  { %v451_v26 = vrot.slane %v439_v24, %v446_v23 }
 0x3a3   :  { %v453_v27 = vsel %vm452_vm7, %v451_v26, %v447_v25 }
 0x3a4   :  { %456 = vst.msk [vmem:[#allocation2] sm:$0x3] %vm455_vm8, %v453_v27 }
 0x3a5   :  { %641 = shalt.err (!%p638_p6)
}
 0x3a6   :  { %s642_s24 = scalar_lea.hbm %s819_s6, 32 }
 0x3a7   :  { %p643_p7 = scmp.ne.s32.totalorder %s819_s6, %s642_s24  ;;  %p646_p8 = scmp.lt.u32.totalorder %s642_s24, %s819_s6 }
 0x3a9   :  { %p648_p9 = pnand %p646_p8, %p643_p7 }
 0x3ab   :  { %651 = shalt.err (!%p648_p9)
}
 0x3ac   :  { %466 = dma.vmem_to_hbm [thread:$0]  %s464_s1, 32, %s819_s6, [#allocation3]  }
 0x3ad   :  { %652 = dma.done.wait [#allocation3], 32  }
 0x3ae   :  { %653 = vsyncadd [#allocation3], 4294967264 }
 0x3af   :  { %654 = dma.done.wait [#allocation5], 256  }
 0x3b0   :  { %655 = vsyncadd [#allocation5], 4294967040 }
 0x3b1   :  { %500 = vsyncpa [#allocation3], 1 }
 0x3b2   :  { %501 = vsyncpa [#allocation5], 1 }

</bundles_post_ra>
